<compile_context>
chip_gen: v7x
topology: tpu7x:2x2x1
jax: 0.10.0
libtpu: 0.0.40
codegen_flags: <defaults>
</compile_context>

<pallas_src>
import jax
import jax.numpy as jnp
import numpy as np
from jax.experimental import pallas as pl
from jax.experimental.pallas import tpu as pltpu

# ----- model config (small, consistent with the module) ---------------------
N_VOCAB = 50
EMBED = 32
SEQ = 16
NUM_FILTERS = 8
FILTER_SIZES = (2, 3, 4)
NUM_CLASSES = 4
HIDDEN = 64           # fc1 output size (hard-coded 64 in the module)
BATCH = 2

KMAX = max(FILTER_SIZES)                 # 4
L_PAD = SEQ                              # window positions (tail positions masked)
F3 = NUM_FILTERS * len(FILTER_SIZES)     # 24
NEG_INF = -1e30

# Packed-blob row offsets (all 8-aligned).
ROW_WC = 0                               # conv weights   (KMAX*EMBED, F3) = (128, 24)
ROW_MB = KMAX * EMBED                    # mask+bias      (L_PAD, F3)      = (16, 24)
ROW_FCW = ROW_MB + L_PAD                 # folded fc W    (F3, F3 padded)  = (24, 24)
ROW_FCB = ROW_FCW + F3                   # folded fc bias (1, F3 padded)
BLOB_ROWS = ROW_FCB + 8                  # pad tail to a sublane multiple -> 176


def textcnn_kernel(tok_ref, table_ref, blob_ref, out_ref):
    """tok_ref:   (B*S, 1)  int32 token ids
       table_ref: (V, E)    f32 embedding table
       blob_ref:  (176, 24) f32 packed conv weights / mask+bias / folded fc
       out_ref:   (B, C)    f32 logits
    """
    # 1) Embedding lookup as exact one-hot matmul (B*S, V) @ (V, E).
    tok = tok_ref[...]                                            # (B*S, 1) i32
    iota = jax.lax.broadcasted_iota(jnp.int32, (BATCH * SEQ, N_VOCAB), 1)
    onehot = jnp.where(tok == iota, 1.0, 0.0).astype(jnp.float32)  # (B*S, V)
    emb = jnp.dot(onehot, table_ref[...],
                  preferred_element_type=jnp.float32)              # (B*S, E)

    # 2) im2col: KMAX-row windows at S positions, zero-padded past the end.
    emb3 = emb.reshape(BATCH, SEQ, EMBED)                          # (B, S, E)
    embp = jnp.concatenate(
        [emb3, jnp.zeros((BATCH, KMAX - 1, EMBED), jnp.float32)], axis=1)
    xw = jnp.concatenate([embp[:, o:o + L_PAD, :] for o in range(KMAX)],
                         axis=2)                                    # (B, S, 4E)
    xw2 = xw.reshape(BATCH * L_PAD, KMAX * EMBED)                   # (32, 128)

    # 3) All three convs in one lane-aligned MXU matmul (K=128, N=24).
    wc = blob_ref[ROW_WC:ROW_WC + KMAX * EMBED, :]                  # (128, 24)
    conv = jnp.dot(xw2, wc, preferred_element_type=jnp.float32)     # (32, 24)
    conv = conv.reshape(BATCH, L_PAD, F3)                           # (B, S, 3F)

    # 4) Masked max-pool over positions; bias folded into mask, ReLU hoisted.
    mb = blob_ref[ROW_MB:ROW_MB + L_PAD, :]                         # (16, 24)
    pooled = jnp.max(conv + mb, axis=1)                             # (B, 3F)
    feat = jnp.maximum(pooled, 0.0)                                 # ReLU

    # 5) Folded fc1·fc2 (dropout = identity in eval mode).
    fcw = blob_ref[ROW_FCW:ROW_FCW + F3, :]                         # (24, 24) padded
    fcb = blob_ref[ROW_FCB:ROW_FCB + 1, :]                          # (1, 24)  padded
    out = jnp.dot(feat, fcw, preferred_element_type=jnp.float32) + fcb
    out_ref[...] = out[:, :NUM_CLASSES].astype(out_ref.dtype)


@jax.jit
def textcnn_forward(tokens, table, blob):
    """tokens: (B, S) int32; table: (V, E) f32; blob: (176, 24) f32."""
    tok2 = tokens.reshape(BATCH * SEQ, 1).astype(jnp.int32)
    vmem = pl.BlockSpec(memory_space=pltpu.MemorySpace.VMEM)
    return pl.pallas_call(
        textcnn_kernel,
        out_shape=jax.ShapeDtypeStruct((BATCH, NUM_CLASSES), jnp.float32),
        in_specs=[vmem, vmem, vmem],
        out_specs=vmem,
    )(tok2, table, blob)


def pack_params(params):
    """One-time host-side packing of all conv/fc constants into one f32 blob."""
    wc = np.zeros((KMAX * EMBED, F3), np.float32)
    mb = np.full((L_PAD, F3), NEG_INF, np.float32)
    for i, k in enumerate(FILTER_SIZES):
        w = np.asarray(params[f'w{k}'])                 # (F, k, E)
        b = np.asarray(params[f'b{k}'])                 # (1, F)
        # wc[o*E + e, i*F + f] = w[f, o, e]
        wt = np.transpose(w, (1, 2, 0)).reshape(k * EMBED, NUM_FILTERS)
        wc[:k * EMBED, i * NUM_FILTERS:(i + 1) * NUM_FILTERS] = wt
        # valid window positions p <= S - k get +bias, the rest get -inf.
        Lk = SEQ - k + 1
        mb[:Lk, i * NUM_FILTERS:(i + 1) * NUM_FILTERS] = b

    # Fold fc1 -> fc2 (no activation between them in the module).
    fc_w = np.asarray(params['fc1_w']) @ np.asarray(params['fc2_w'])            # (3F, C)
    fc_b = np.asarray(params['fc1_b']) @ np.asarray(params['fc2_w']) \
        + np.asarray(params['fc2_b'])                                           # (1, C)
    fcw_pad = np.zeros((F3, F3), np.float32)
    fcw_pad[:, :NUM_CLASSES] = fc_w
    fcb_pad = np.zeros((8, F3), np.float32)
    fcb_pad[0, :NUM_CLASSES] = fc_b[0]

    blob = np.concatenate([wc, mb, fcw_pad, fcb_pad], axis=0)
    assert blob.shape == (BLOB_ROWS, F3)
    return jnp.asarray(blob)


def reference_forward(tokens, params):
    """Pure-JAX reference mirroring the PyTorch forward (eval mode)."""
    emb = params['embedding'][tokens]               # (B, S, E)
    pooled = []
    for k in FILTER_SIZES:
        w = params[f'w{k}']                         # (F, k, E)
        b = params[f'b{k}']                         # (1, F)
        L = SEQ - k + 1
        acc = jnp.zeros((tokens.shape[0], L, NUM_FILTERS), jnp.float32)
        for o in range(k):
            acc = acc + jnp.einsum('ble,fe->blf', emb[:, o:o + L, :], w[:, o, :])
        act = jax.nn.relu(acc + b)
        pooled.append(jnp.max(act, axis=1))
    feat = jnp.concatenate(pooled, axis=1)
    h = feat @ params['fc1_w'] + params['fc1_b']
    return h @ params['fc2_w'] + params['fc2_b']


def init_params(key):
    ks = jax.random.split(key, 12)
    scale = 0.1
    embedding = scale * jax.random.normal(ks[0], (N_VOCAB, EMBED), jnp.float32)
    # nn.Embedding padding_idx = n_vocab - 1: zero that row at init.
    embedding = embedding.at[N_VOCAB - 1].set(0.0)

    params = {'embedding': embedding}
    for i, k in enumerate(FILTER_SIZES):
        params[f'w{k}'] = scale * jax.random.normal(
            ks[1 + 2 * i], (NUM_FILTERS, k, EMBED), jnp.float32)
        params[f'b{k}'] = scale * jax.random.normal(
            ks[2 + 2 * i], (1, NUM_FILTERS), jnp.float32)

    in_feat = NUM_FILTERS * len(FILTER_SIZES)
    params['fc1_w'] = scale * jax.random.normal(ks[8], (in_feat, HIDDEN), jnp.float32)
    params['fc1_b'] = scale * jax.random.normal(ks[9], (1, HIDDEN), jnp.float32)
    params['fc2_w'] = scale * jax.random.normal(ks[10], (HIDDEN, NUM_CLASSES), jnp.float32)
    params['fc2_b'] = scale * jax.random.normal(ks[11], (1, NUM_CLASSES), jnp.float32)
    return params


if __name__ == "__main__":
    key = jax.random.PRNGKey(0)
    pkey, tkey = jax.random.split(key)
    params = init_params(pkey)

    # PyTorch forward uses x[0] as the token-id tensor; here we just build it.
    tokens = jax.random.randint(tkey, (BATCH, SEQ), 0, N_VOCAB, dtype=jnp.int32)

    blob = pack_params(params)                      # one-time host packing
    out = textcnn_forward(tokens, params['embedding'], blob)
    out = jax.block_until_ready(out)

    ref = reference_forward(tokens, params)
    assert out.shape == (BATCH, NUM_CLASSES)
    assert jnp.allclose(out, ref, atol=1e-5, rtol=1e-4), (out, ref)

    print("KERNEL_OK")
</pallas_src>

<mosaic_0001>
module attributes {stable_mosaic.version = 11 : i64} {
  func.func @textcnn_kernel(%arg0: memref<32x1xi32, #tpu.memory_space<vmem>>, %arg1: memref<50x32xf32, #tpu.memory_space<vmem>>, %arg2: memref<176x24xf32, #tpu.memory_space<vmem>>, %arg3: memref<2x4xf32, #tpu.memory_space<vmem>>) attributes {dimension_semantics = [], scalar_prefetch = 0 : i64, scratch_operands = 0 : i64, tpu.core_type = #tpu.core_type<tc>} {
    %c0 = arith.constant 0 : index
    %c0_0 = arith.constant 0 : index
    %0 = vector.load %arg0[%c0, %c0_0] : memref<32x1xi32, #tpu.memory_space<vmem>>, vector<32x1xi32>
    %1 = tpu.iota {dimensions = array<i32: 1>} : vector<32x50xi32>
    %2 = vector.broadcast %0 : vector<32x1xi32> to vector<32x50xi32>
    %3 = arith.cmpi eq, %2, %1 : vector<32x50xi32>
    %cst = arith.constant 1.000000e+00 : f32
    %cst_1 = arith.constant 0.000000e+00 : f32
    %4 = vector.broadcast %cst : f32 to vector<32x50xf32>
    %5 = vector.broadcast %cst_1 : f32 to vector<32x50xf32>
    %6 = arith.select %3, %4, %5 : vector<32x50xi1>, vector<32x50xf32>
    %c0_2 = arith.constant 0 : index
    %c0_3 = arith.constant 0 : index
    %7 = vector.load %arg1[%c0_2, %c0_3] : memref<50x32xf32, #tpu.memory_space<vmem>>, vector<50x32xf32>
    %cst_4 = arith.constant dense<0.000000e+00> : vector<32x32xf32>
    %8 = tpu.matmul %6, %7, %cst_4 {dimension_numbers = #tpu.dot_dimension_numbers<[1], [0], [0], [1], [0, 0, 1, 1], [], []>} : vector<32x50xf32>, vector<50x32xf32>, vector<32x32xf32> -> vector<32x32xf32>
    %9 = vector.shape_cast %8 : vector<32x32xf32> to vector<2x16x32xf32>
    %cst_5 = arith.constant 0.000000e+00 : f32
    %10 = vector.broadcast %cst_5 : f32 to vector<2x3x32xf32>
    %11 = tpu.concatenate %9, %10 in 1 : vector<2x16x32xf32>, vector<2x3x32xf32> -> vector<2x19x32xf32>
    %12 = vector.extract_strided_slice %11 {offsets = [0, 0, 0], sizes = [2, 16, 32], strides = [1, 1, 1]} : vector<2x19x32xf32> to vector<2x16x32xf32>
    %13 = vector.extract_strided_slice %11 {offsets = [0, 1, 0], sizes = [2, 16, 32], strides = [1, 1, 1]} : vector<2x19x32xf32> to vector<2x16x32xf32>
    %14 = vector.extract_strided_slice %11 {offsets = [0, 2, 0], sizes = [2, 16, 32], strides = [1, 1, 1]} : vector<2x19x32xf32> to vector<2x16x32xf32>
    %15 = vector.extract_strided_slice %11 {offsets = [0, 3, 0], sizes = [2, 16, 32], strides = [1, 1, 1]} : vector<2x19x32xf32> to vector<2x16x32xf32>
    %16 = tpu.concatenate %12, %13, %14, %15 in 2 : vector<2x16x32xf32>, vector<2x16x32xf32>, vector<2x16x32xf32>, vector<2x16x32xf32> -> vector<2x16x128xf32>
    %17 = vector.shape_cast %16 : vector<2x16x128xf32> to vector<32x128xf32>
    %c0_6 = arith.constant 0 : index
    %c0_7 = arith.constant 0 : index
    %18 = vector.load %arg2[%c0_6, %c0_7] : memref<176x24xf32, #tpu.memory_space<vmem>>, vector<128x24xf32>
    %cst_8 = arith.constant dense<0.000000e+00> : vector<32x24xf32>
    %19 = tpu.matmul %17, %18, %cst_8 {dimension_numbers = #tpu.dot_dimension_numbers<[1], [0], [0], [1], [0, 0, 1, 1], [], []>} : vector<32x128xf32>, vector<128x24xf32>, vector<32x24xf32> -> vector<32x24xf32>
    %20 = vector.shape_cast %19 : vector<32x24xf32> to vector<2x16x24xf32>
    %c128 = arith.constant 128 : index
    %c0_9 = arith.constant 0 : index
    %21 = vector.load %arg2[%c128, %c0_9] : memref<176x24xf32, #tpu.memory_space<vmem>>, vector<16x24xf32>
    %22 = vector.shape_cast %21 : vector<16x24xf32> to vector<1x16x24xf32>
    %23 = vector.broadcast %22 : vector<1x16x24xf32> to vector<2x16x24xf32>
    %24 = arith.addf %20, %23 : vector<2x16x24xf32>
    %cst_10 = arith.constant dense<0xFF800000> : vector<2x24xf32>
    %25 = vector.multi_reduction <maximumf>, %24, %cst_10 [1] : vector<2x16x24xf32> to vector<2x24xf32>
    %cst_11 = arith.constant 0.000000e+00 : f32
    %26 = vector.broadcast %cst_11 : f32 to vector<2x24xf32>
    %27 = arith.maximumf %25, %26 : vector<2x24xf32>
    %c144 = arith.constant 144 : index
    %c0_12 = arith.constant 0 : index
    %28 = vector.load %arg2[%c144, %c0_12] : memref<176x24xf32, #tpu.memory_space<vmem>>, vector<24x24xf32>
    %c168 = arith.constant 168 : index
    %c0_13 = arith.constant 0 : index
    %29 = vector.load %arg2[%c168, %c0_13] : memref<176x24xf32, #tpu.memory_space<vmem>>, vector<1x24xf32>
    %cst_14 = arith.constant dense<0.000000e+00> : vector<2x24xf32>
    %30 = tpu.matmul %27, %28, %cst_14 {dimension_numbers = #tpu.dot_dimension_numbers<[1], [0], [0], [1], [0, 0, 1, 1], [], []>} : vector<2x24xf32>, vector<24x24xf32>, vector<2x24xf32> -> vector<2x24xf32>
    %31 = vector.broadcast %29 : vector<1x24xf32> to vector<2x24xf32>
    %32 = arith.addf %30, %31 : vector<2x24xf32>
    %33 = vector.extract_strided_slice %32 {offsets = [0, 0], sizes = [2, 4], strides = [1, 1]} : vector<2x24xf32> to vector<2x4xf32>
    %c0_15 = arith.constant 0 : index
    %c0_16 = arith.constant 0 : index
    %34 = vector.load %arg3[%c0_15, %c0_16] : memref<2x4xf32, #tpu.memory_space<vmem>>, vector<2x4xf32>
    tpu.vector_store %arg3[%c0_15, %c0_16], %33 {strides = array<i32>} : memref<2x4xf32, #tpu.memory_space<vmem>>, vector<2x4xf32>,
    return
  }
}

</mosaic_0001>

<bundles_post_ra>
// kernel: textcnn_forward.1
= control target key start
LH: loop header
LB: loop body
LE: loop exit
PB: predicated region body
PF: predicated region fallthrough
CT: control target
= control target key end

     0   :  { %v684_v2 = vmov 0   ;;  %s867_s0 = inlined_call_operand.vmem [shape: s32[32,1], index: 0, kind: input, shape index: {}]   ;;  %s868_s1 = inlined_call_operand.vmem [shape: f32[50,32], index: 1, kind: input, shape index: {}]   ;;  %s869_s2 = inlined_call_operand.vmem [shape: f32[176,24], index: 2, kind: input, shape index: {}]   ;;  %s870_s3 = inlined_call_operand.hbm [shape: f32[2,4], index: 3, kind: output, shape index: {}]  }
   0x1   :  { %v15_v0 = vld [vmem:[%s867_s0] sm:$0xff]  ;;  %v17_v1 = vld [vmem:[%s867_s0 + $0x10] sm:$0xff]  ;;  %628 = vset.pattern.permute.xlu0 %v684_v2  ;;  %629 = vset.pattern.permute.xlu1 %v684_v2  ;;  %v16_v3 = vld [vmem:[%s867_s0 + $0x8] sm:$0xff] }
   0x2   :  { %v41_v4 = vld [vmem:[%s868_s1] sm:$0xff]  ;;  %v42_v5 = vld [vmem:[%s868_s1 + $0x8] sm:$0xff]  ;;  %22 = vperm.xlu0 %628, %v15_v0   ;;  %28 = vperm.xlu1 %629, %v17_v1   ;;  %v18_v6 = vld [vmem:[%s867_s0 + $0x18] sm:$0xff] }
   0x3   :  { %v573_v7 = vpack.c.bf16 %v42_v5, %v41_v4  ;;  %v43_v8 = vld [vmem:[%s868_s1 + $0x10] sm:$0xff]  ;;  %v44_v9 = vld [vmem:[%s868_s1 + $0x18] sm:$0xff]  ;;  %v45_v11 = vld [vmem:[%s868_s1 + $0x20] sm:$0xff] }
   0x4   :  { %v577_v10 = vpack.c.bf16 %v44_v9, %v43_v8  ;;  %v46_v12 = vld [vmem:[%s868_s1 + $0x28] sm:$0xff] }
   0x5   :  { %8 = vsyncpa [#allocation3], 0  ;;  %574 = vmatprep.subr.bf16.mxu0 %v573_v7  ;;  %v581_v13 = vpack.c.bf16 %v46_v12, %v45_v11  ;;  %v47_v14 = vld [vmem:[%s868_s1 + $0x30] sm:$0x3]  ;;  %vm61_vm0 = vcmask 1041408   ;;  %v19_v15 = vlaneseq  ;;  %vm48_vm1 = vcmask 408576  }
   0x6   :  { %576 = vmatpush3.bf16.msra.mxu0 %v573_v7  ;;  %25 = vperm.xlu0 %628, %v16_v3   ;;  %v685_v19 = vmov 0.0   ;;  %v236_v26 = vld [vmem:[%s869_s2] sm:$0xff]  ;;  %v237_v27 = vld [vmem:[%s869_s2 + $0x8] sm:$0xff]  ;;  %v238_v28 = vld [vmem:[%s869_s2 + $0x10] sm:$0xff]  ;;  %vm177_vm6 = vcmask 1045504   ;;  %vm155_vm7 = vcmask 1046528  }
   0x7   :  { %31 = vperm.xlu1 %629, %v18_v6   ;;  %578 = vmatprep.subr.bf16.mxu0 %v577_v10  ;;  %v20_v16 = vand.u32 127, %v19_v15  ;;  %v585_v29 = vpack.c.bf16 %v237_v27, %v236_v26  ;;  %v239_v30 = vld [vmem:[%s869_s2 + $0x18] sm:$0xff]  ;;  %v240_v32 = vld [vmem:[%s869_s2 + $0x20] sm:$0xff]  ;;  %v241_v33 = vld [vmem:[%s869_s2 + $0x28] sm:$0xff]  ;;  %v181_v50 = vrot.slane %v685_v19, 2  ;;  %v159_v51 = vrot.slane %v685_v19, 1 }
   0x8   :  { %v589_v31 = vpack.c.bf16 %v239_v30, %v238_v28  ;;  %v593_v34 = vpack.c.bf16 %v241_v33, %v240_v32  ;;  %v242_v35 = vld [vmem:[%s869_s2 + $0x30] sm:$0xff]  ;;  %v243_v36 = vld [vmem:[%s869_s2 + $0x38] sm:$0xff]  ;;  %v244_v38 = vld [vmem:[%s869_s2 + $0x40] sm:$0xff]  ;;  %v203_v53 = vrot.slane %v685_v19, 3  ;;  %vm199_vm8 = vcmask 1044480   ;;  %s686_s8 = smov 64  }
   0x9   :  { %586 = vmatprep.subr.bf16.mxu1 %v585_v29  ;;  %v597_v37 = vpack.c.bf16 %v243_v36, %v242_v35  ;;  %v245_v39 = vld [vmem:[%s869_s2 + $0x48] sm:$0xff]  ;;  %v246_v41 = vld [vmem:[%s869_s2 + $0x50] sm:$0xff]  ;;  %v247_v42 = vld [vmem:[%s869_s2 + $0x58] sm:$0xff]  ;;  %s687_s9 = smov 32   ;;  %s688_s10 = smov 96   ;;  %vm221_vm9 = vcmask 261120  }
   0xa   :  { %580 = vmatpush3.bf16.msra.mxu0 %v577_v10  ;;  %588 = vmatpush3.bf16.msra.mxu1 %v585_v29  ;;  %v601_v40 = vpack.c.bf16 %v245_v39, %v244_v38  ;;  %v605_v43 = vpack.c.bf16 %v247_v42, %v246_v41  ;;  %v248_v44 = vld [vmem:[%s869_s2 + $0x60] sm:$0xff]  ;;  %v249_v45 = vld [vmem:[%s869_s2 + $0x68] sm:$0xff]  ;;  %v250_v47 = vld [vmem:[%s869_s2 + $0x70] sm:$0xff]  ;;  %vm226_vm10 = vcmask 523264   ;;  %vm231_vm11 = vcmask 785408   ;;  %s691_s23 = smov [#allocation2]  }
   0xb   :  { %582 = vmatprep.subr.bf16.mxu0 %v581_v13  ;;  %590 = vmatprep.subr.bf16.mxu1 %v589_v31  ;;  %v609_v46 = vpack.c.bf16 %v249_v45, %v248_v44  ;;  %v251_v48 = vld [vmem:[%s869_s2 + $0x78] sm:$0xff]  ;;  %vm690_vm12 = vmmov 0   ;;  %vm343_vm13 = vcmask 195584   ;;  %vm374_vm14 = vcmask 1041409   ;;  %s456_s24 = sshll.u32 %s691_s23, 4  ;;  %s457_s24 = int_to_ptr.vmem [resolvable:$true] %s456_s24 }
   0xc   :  { %v613_v49 = vpack.c.bf16 %v251_v48, %v250_v47  ;;  %vm448_vm15 = vcmask 25600   ;;  %s660_s25 = scalar_lea.vmem %s457_s24, 32  ;;  %p665_p1 = scmp.lt.s32.totalorder %s457_s24, %s457_s24 }
   0xd   :  { %p661_p0 = scmp.ne.s32.totalorder %s457_s24, %s660_s25  ;;  %p666_p2 = scmp.lt.s32.totalorder %s660_s25, %s660_s25 }
   0xe   :  { %584 = vmatpush3.bf16.msra.mxu0 %v581_v13  ;;  %592 = vmatpush3.bf16.msra.mxu1 %v589_v31 }
   0xf   :  { %518 = vmatprep.subr.msk.mxu0 %vm61_vm0, %v47_v14  ;;  %594 = vmatprep.subr.bf16.mxu1 %v593_v34  ;;  %p667_p3 = por %p666_p2, %p665_p1 }
  0x11   :  { %p668_p4 = pnand %p667_p3, %p661_p0 }
  0x12   :  { %519 = vmatpush3.msk.msra.mxu0 %vm61_vm0, %v47_v14  ;;  %596 = vmatpush3.bf16.msra.mxu1 %v593_v34 }
  0x13   :  { %598 = vmatprep.subr.bf16.mxu1 %v597_v37 }
  0x16   :  { %600 = vmatpush3.bf16.msra.mxu1 %v597_v37 }
  0x17   :  { %602 = vmatprep.subr.bf16.mxu1 %v601_v40 }
  0x1a   :  { %604 = vmatpush3.bf16.msra.mxu1 %v601_v40 }
  0x1b   :  { %606 = vmatprep.subr.bf16.mxu1 %v605_v43 }
  0x1e   :  { %608 = vmatpush3.bf16.msra.mxu1 %v605_v43 }
  0x1f   :  { %610 = vmatprep.subr.bf16.mxu1 %v609_v46 }
  0x22   :  { %612 = vmatpush3.bf16.msra.mxu1 %v609_v46 }
  0x23   :  { %614 = vmatprep.subr.bf16.mxu1 %v613_v49 }
  0x26   :  { %616 = vmatpush3.bf16.msra.mxu1 %v613_v49 }
  0x81   :  { %v23_v17 = vpop.permute.xlu0 %22  ;;  %v29_v18 = vpop.permute.xlu1 %28 }
  0x82   :  { %vm33_vm2 = vcmp.eq.s32.totalorder %v23_v17, %v20_v16  ;;  %vm35_vm3 = vcmp.eq.s32.totalorder %v29_v18, %v20_v16 }
  0x83   :  { %v37_v20 = vsel %vm33_vm2, 1.0, %v685_v19  ;;  %v39_v23 = vsel %vm35_vm3, 1.0, %v685_v19 }
  0x84   :  { %520 = vmatprep.mubr.msk.f32.mxu0 %vm48_vm1, %v37_v20 }
  0x85   :  { %v26_v21 = vpop.permute.xlu0 %25 }
  0x86   :  { %v32_v22 = vpop.permute.xlu1 %31  ;;  %vm34_vm4 = vcmp.eq.s32.totalorder %v26_v21, %v20_v16 }
  0x87   :  { %v38_v24 = vsel %vm34_vm4, 1.0, %v685_v19  ;;  %vm36_vm5 = vcmp.eq.s32.totalorder %v32_v22, %v20_v16 }
  0x88   :  { %521 = vmatmul.mubr.msk.f32.vlgmr.msra.gmra.mrb[0].mxu0 %vm48_vm1, %v38_v24  ;;  %v40_v25 = vsel %vm36_vm5, 1.0, %v685_v19 }
  0x89   :  { %523 = vmatprep.mubr.msk.f32.mxu0 %vm48_vm1, %v39_v23 }
  0x8c   :  { %524 = vmatmul.mubr.msk.f32.gmra.mrb[2].mxu0 %vm48_vm1, %v40_v25 }
  0x8d   :  { %570 = vmatprep.mubr.msk.f32.mxu0 %vm690_vm12, %v685_v19 }
 0x15b   :  { %v522_v52 = vpop.f32.mrb[0].mxu0 }
 0x15c   :  { %v157_v54 = vrot.slane %v522_v52, 1  ;;  %v179_v55 = vrot.slane %v522_v52, 2  ;;  %v201_v56 = vrot.slane %v522_v52, 3  ;;  %v131_v57 = vpop.f32.mrb[1].mxu0 }
 0x15d   :  { %v156_v58 = vrot.slane %v131_v57, 1  ;;  %v178_v59 = vrot.slane %v131_v57, 2  ;;  %v200_v60 = vrot.slane %v131_v57, 3 }
 0x15e   :  { %v182_v61 = vsel %vm177_vm6, %v179_v55, %v181_v50  ;;  %v160_v62 = vsel %vm155_vm7, %v157_v54, %v159_v51  ;;  %v204_v3 = vsel %vm199_vm8, %v201_v56, %v203_v53 }
 0x15f   :  { %v802_v63 = vpop.f32.mrb[2].mxu0  ;;  %v180_v0 = vsel %vm177_vm6, %v178_v59, %v179_v55  ;;  %v158_v1 = vsel %vm155_vm7, %v156_v58, %v157_v54  ;;  %v202_v2 = vsel %vm199_vm8, %v200_v60, %v201_v56  ;;  %v364_v54 = vld [vmem:[%s869_s2 + $0x90] sm:$0xff]  ;;  %v365_v55 = vld [vmem:[%s869_s2 + $0x98] sm:$0xff]  ;;  %v366_v58 = vld [vmem:[%s869_s2 + $0xa0] sm:$0xff] }
 0x160   :  { %v162_v4 = vrot.slane %v802_v63, 1  ;;  %v184_v5 = vrot.slane %v802_v63, 2  ;;  %v206_v6 = vrot.slane %v802_v63, 3  ;;  %v141_v7 = vpop.f32.mrb[3].mxu0  ;;  %v635_v8 = vpack.i.bf16 %v182_v61, %v180_v0  ;;  %v338_v59 = vld [vmem:[%s869_s2 + $0x88] sm:$0xff]  ;;  %v337_v60 = vld [vmem:[%s869_s2 + $0x80] sm:$0xff] }
 0x161   :  { %v161_v9 = vrot.slane %v141_v7, 1  ;;  %v183_v10 = vrot.slane %v141_v7, 2  ;;  %v205_v11 = vrot.slane %v141_v7, 3  ;;  %v630_v12 = vpack.i.bf16 %v160_v62, %v158_v1 }
 0x162   :  { %636 = vrot.lane.b32.xlu1 %v635_v8, %s686_s8  ;;  %v640_v13 = vpack.i.bf16 %v204_v3, %v202_v2  ;;  %v164_v14 = vsel %vm155_vm7, %v162_v4, %v159_v51  ;;  %v186_v15 = vsel %vm177_vm6, %v184_v5, %v181_v50  ;;  %v208_v16 = vsel %vm199_vm8, %v206_v6, %v203_v53 }
 0x163   :  { %631 = vrot.lane.b32.xlu0 %v630_v12, %s687_s9  ;;  %v163_v17 = vsel %vm155_vm7, %v161_v9, %v162_v4  ;;  %v185_v18 = vsel %vm177_vm6, %v183_v10, %v184_v5  ;;  %v207_v20 = vsel %vm199_vm8, %v205_v11, %v206_v6  ;;  %v618_v56 = vpack.c.bf16 %v365_v55, %v364_v54 }
 0x164   :  { %v645_v21 = vpack.i.bf16 %v164_v14, %v163_v17  ;;  %v650_v22 = vpack.i.bf16 %v186_v15, %v185_v18  ;;  %v655_v23 = vpack.i.bf16 %v208_v16, %v207_v20 }
 0x166   :  { %646 = vrot.lane.b32.xlu1 %v645_v21, %s687_s9 }
 0x167   :  { %641 = vrot.lane.b32.xlu0 %v640_v13, %s688_s10 }
 0x16a   :  { %656 = vrot.lane.b32.xlu1 %v655_v23, %s688_s10 }
 0x16b   :  { %651 = vrot.lane.b32.xlu0 %v650_v22, %s686_s8 }
 0x1d4   :  { %v637_v24 = vpop.permute.xlu1 %636 }
 0x1d5   :  { %v632_v25 = vpop.permute.xlu0 %631  ;;  %v639_v28 = vunpack.i.h.bf16 %v637_v24  ;;  %v638_v29 = vunpack.i.l.bf16 %v637_v24 }
 0x1d6   :  { %v634_v26 = vunpack.i.h.bf16 %v632_v25  ;;  %v633_v27 = vunpack.i.l.bf16 %v632_v25 }
 0x1d8   :  { %v647_v30 = vpop.permute.xlu1 %646  ;;  %v222_v31 = vsel %vm221_vm9, %v131_v57, %v633_v27  ;;  %v223_v32 = vsel %vm221_vm9, %v522_v52, %v634_v26  ;;  %v689_v57 = vmov 0.0|0.0   ;;  %v469_v26 = vld [vmem:[%s869_s2 + $0xa8] ss:$0 sm:$0xff] }
 0x1d9   :  { %v642_v33 = vpop.permute.xlu0 %641  ;;  %v649_v36 = vunpack.i.h.bf16 %v647_v30  ;;  %v648_v37 = vunpack.i.l.bf16 %v647_v30  ;;  %v227_v38 = vsel %vm226_vm10, %v222_v31, %v638_v29  ;;  %v228_v39 = vsel %vm226_vm10, %v223_v32, %v639_v28  ;;  %617 = vmatprep.subr.bf16.mxu0 %v689_v57 }
 0x1da   :  { %v644_v34 = vunpack.i.h.bf16 %v642_v33  ;;  %v643_v35 = vunpack.i.l.bf16 %v642_v33  ;;  %619 = vmatpush3.bf16.msra.mxu0 %v618_v56 }
 0x1db   :  { %v224_v48 = vsel %vm221_vm9, %v141_v7, %v648_v37  ;;  %v225_v49 = vsel %vm221_vm9, %v802_v63, %v649_v36  ;;  %568 = vmatprep.subr.mxu0 %v685_v19 }
 0x1dc   :  { %v232_v40 = vsel %vm231_vm11, %v227_v38, %v643_v35  ;;  %v657_v41 = vpop.permute.xlu1 %656  ;;  %v233_v42 = vsel %vm231_vm11, %v228_v39, %v644_v34 }
 0x1dd   :  { %558 = vmatprep.mubr.f32.mxu1 %v232_v40  ;;  %v652_v43 = vpop.permute.xlu0 %651  ;;  %v659_v44 = vunpack.i.h.bf16 %v657_v41  ;;  %v658_v45 = vunpack.i.l.bf16 %v657_v41 }
 0x1de   :  { %v654_v46 = vunpack.i.h.bf16 %v652_v43  ;;  %v653_v47 = vunpack.i.l.bf16 %v652_v43  ;;  %559 = vmatmul.mubr.f32.vlgmr.msra.gmra.mrb[0].mxu1 %v233_v42  ;;  %569 = vmatpush3.msra.mxu0 %v366_v58 }
 0x1e0   :  { %v229_v50 = vsel %vm226_vm10, %v224_v48, %v653_v47  ;;  %v230_v51 = vsel %vm226_vm10, %v225_v49, %v654_v46 }
 0x1e1   :  { %v234_v52 = vsel %vm231_vm11, %v229_v50, %v658_v45  ;;  %v235_v53 = vsel %vm231_vm11, %v230_v51, %v659_v44 }
 0x1e2   :  { %561 = vmatprep.mubr.f32.mxu1 %v234_v52 }
 0x1e3   :  { %562 = vmatmul.mubr.f32.gmra.mrb[2].mxu1 %v235_v53 }
 0x2b1   :  { %v560_v61 = vpop.f32.mrb[0].mxu1 }
 0x2b2   :  { %v340_v62 = vadd.f32 %v560_v61, %v338_v59  ;;  %v318_v63 = vpop.f32.mrb[1].mxu1 }
 0x2b3   :  { %v339_v0 = vadd.f32 %v337_v60, %v318_v63 }
 0x2b4   :  { %v345_v1 = vsel %vm343_vm13, %v340_v62, -inf }
 0x2b5   :  { %v344_v2 = vsel %vm343_vm13, %v339_v0, -inf }
 0x2b6   :  { %v346_v3 = vmax.f32 %v344_v2, %v345_v1  ;;  %v563_v19 = vpop.f32.mrb[2].mxu1 }
 0x2b7   :  { %v342_v4 = vadd.f32 %v563_v19, %v338_v59  ;;  %v328_v5 = vpop.f32.mrb[3].mxu1 }
 0x2b8   :  { %v347_v6 = vrot.slane %v346_v3, 4  ;;  %v341_v7 = vadd.f32 %v337_v60, %v328_v5 }
 0x2b9   :  { %v354_v8 = vsel %vm343_vm13, %v342_v4, -inf }
 0x2ba   :  { %v348_v9 = vmax.f32 %v346_v3, %v347_v6  ;;  %v353_v10 = vsel %vm343_vm13, %v341_v7, -inf }
 0x2bb   :  { %v355_v11 = vmax.f32 %v353_v10, %v354_v8 }
 0x2bc   :  { %v349_v12 = vrot.slane %v348_v9, 2 }
 0x2bd   :  { %v356_v13 = vrot.slane %v355_v11, 4 }
 0x2be   :  { %v350_v14 = vmax.f32 %v348_v9, %v349_v12 }
 0x2bf   :  { %v357_v15 = vmax.f32 %v355_v11, %v356_v13 }
 0x2c0   :  { %v351_v16 = vrot.slane %v350_v14, 1 }
 0x2c1   :  { %v358_v17 = vrot.slane %v357_v15, 2 }
 0x2c2   :  { %v352_v20 = vmax.f32 %v350_v14, %v351_v16 }
 0x2c3   :  { %v359_v18 = vmax.f32 %v357_v15, %v358_v17 }
 0x2c4   :  { %v362_v23 = vmax.f32 %v352_v20, 0.0 }
 0x2c5   :  { %v360_v21 = vrot.slane %v359_v18, 1 }
 0x2c7   :  { %v361_v22 = vmax.f32 %v359_v18, %v360_v21 }
 0x2c9   :  { %v363_v24 = vmax.f32 %v361_v22, 0.0 }
 0x2cb   :  { %v375_v25 = vsel %vm374_vm14, %v363_v24, %v362_v23 }
 0x2cc   :  { %571 = vmatmul.mubr.msk.f32.vlgmr.msra.gmra.mrb[4].mxu0 %vm343_vm13, %v375_v25 }
 0x39f   :  { %v444_v27 = vpop.f32.mrb[4].mxu0 }
 0x3a0   :  { %v445_v28 = vadd.f32 %v469_v26, %v444_v27  ;;  %v572_v29 = vpop.f32.mrb[5].mxu0 }
 0x3a2   :  { %449 = vst.msk [vmem:[#allocation2] sm:$0x3] %vm448_vm15, %v445_v28 }
 0x3a3   :  { %671 = shalt.err (!%p668_p4)
}
 0x3a4   :  { %s672_s28 = scalar_lea.hbm %s870_s3, 32 }
 0x3a5   :  { %p673_p5 = scmp.ne.s32.totalorder %s870_s3, %s672_s28  ;;  %p676_p6 = scmp.lt.u32.totalorder %s672_s28, %s870_s3 }
 0x3a7   :  { %p678_p7 = pnand %p676_p6, %p673_p5 }
 0x3a9   :  { %681 = shalt.err (!%p678_p7)
}
 0x3aa   :  { %459 = dma.vmem_to_hbm [thread:$0]  %s457_s24, 32, %s870_s3, [#allocation3]  }
 0x3ab   :  { %682 = dma.done.wait [#allocation3], 32  }
 0x3ac   :  { %683 = vsyncadd [#allocation3], 4294967264 }
 0x3ad   :  { %463 = vsyncpa [#allocation3], 1 }

</bundles_post_ra>
